<compile_context>
chip_gen: v5e
topology: v5e:2x2
jax: 0.10.0
libtpu: 0.0.40
codegen_flags: <defaults>
</compile_context>

<pallas_src>
import functools

import jax
import jax.numpy as jnp
import numpy as np
from jax.experimental import pallas as pl
from jax.experimental.pallas import tpu as pltpu


def _cce_tile_kernel(yt_ref, yp_ref, sum_ref, cnt_ref, *, n_rows, tile_rows):
    """One row-tile of masked soft-target cross-entropy.

    yt_ref : (TM, C)    "y_true" -> logits (input of the swapped-arg CE)
    yp_ref : (TM, C)    "y_pred" -> soft / probability targets
    sum_ref: (1, 1, 1)  this tile's partial sum of masked per-row CE
    cnt_ref: (1, 1, 1)  this tile's partial count of kept rows
    """
    i = pl.program_id(0)

    yt = yt_ref[...].astype(jnp.float32)
    yp = yp_ref[...].astype(jnp.float32)

    # Row validity: real row (ragged last tile) AND observed label (sum > 0).
    row_ids = i * tile_rows + jax.lax.broadcasted_iota(jnp.int32, (tile_rows, 1), 0)
    in_range = row_ids < n_rows
    observed = jnp.sum(yt, axis=-1, keepdims=True) > 0.0
    mask = jnp.logical_and(in_range, observed)                       # (TM, 1) bool

    # Numerically stable logsumexp over the class (lane) axis.
    m = jnp.max(yt, axis=-1, keepdims=True)                          # (TM, 1)
    lse = m + jnp.log(jnp.sum(jnp.exp(yt - m), axis=-1, keepdims=True))

    # CE_row = -sum(yp * (yt - lse)) = lse * sum(yp) - sum(yp * yt)
    sp = jnp.sum(yp, axis=-1, keepdims=True)                         # (TM, 1)
    spt = jnp.sum(yp * yt, axis=-1, keepdims=True)                   # (TM, 1)
    ce_row = lse * sp - spt                                          # (TM, 1)

    # jnp.where is a select, so garbage in out-of-range padded rows (possibly
    # NaN/Inf) can never poison the partial sums.
    sum_ref[0] = jnp.sum(jnp.where(mask, ce_row, 0.0), axis=0, keepdims=True)
    cnt_ref[0] = jnp.sum(mask.astype(jnp.float32), axis=0, keepdims=True)


def _round_up(x, m):
    return ((x + m - 1) // m) * m


def _choose_row_tile(n, c, itemsize_true, itemsize_pred,
                     vmem_budget_bytes=12 * 1024 * 1024):
    """Largest row tile s.t. 2 inputs x 2 pipeline buffers fit the VMEM budget.

    The budget is deliberately conservative (<= 12 MiB of input buffers) so the
    same tiling stays inside v5e's 16 MiB default scoped VMEM and well under
    v7x's 64 MiB physical VMEM, while being large enough (hundreds of rows) to
    amortize the ~0.35 us per-grid-step overhead and sit near the HBM roofline.
    """
    c_pad = _round_up(c, 128)                                     # lane padding in VMEM
    bytes_per_row = 2 * c_pad * (itemsize_true + itemsize_pred)   # 2 pipeline buffers/input
    tm = vmem_budget_bytes // max(1, bytes_per_row)
    tm = max(8, min(1024, tm))
    tm = min(tm, _round_up(n, 8))                                 # no bigger than needed
    tm = max(8, (tm // 8) * 8)                                    # sublane-aligned
    return int(tm)


def custom_categorical_cross_entropy_loss(y_pred, y_true, *, tm=None,
                                          vmem_limit_bytes=32 * 1024 * 1024):
    """Pallas implementation of CustomCategoricalCrossEntropyLoss.forward."""
    assert y_pred.shape == y_true.shape and y_pred.ndim == 2
    n, c = y_true.shape

    if tm is None:
        tm = _choose_row_tile(
            n, c,
            jnp.dtype(y_true.dtype).itemsize,
            jnp.dtype(y_pred.dtype).itemsize,
        )
    else:
        tm = max(8, (int(tm) // 8) * 8)                           # sublane-aligned

    num_tiles = pl.cdiv(n, tm)

    sums, cnts = pl.pallas_call(
        functools.partial(_cce_tile_kernel, n_rows=n, tile_rows=tm),
        out_shape=(
            jax.ShapeDtypeStruct((num_tiles, 1, 1), jnp.float32),
            jax.ShapeDtypeStruct((num_tiles, 1, 1), jnp.float32),
        ),
        grid_spec=pltpu.PrefetchScalarGridSpec(
            num_scalar_prefetch=0,
            grid=(num_tiles,),
            in_specs=[
                pl.BlockSpec((tm, c), lambda i: (i, 0)),   # y_true tile (logits)
                pl.BlockSpec((tm, c), lambda i: (i, 0)),   # y_pred tile (targets)
            ],
            out_specs=(
                pl.BlockSpec((1, 1, 1), lambda i: (i, 0, 0)),   # per-tile CE sum
                pl.BlockSpec((1, 1, 1), lambda i: (i, 0, 0)),   # per-tile kept count
            ),
        ),
        compiler_params=pltpu.CompilerParams(
            dimension_semantics=("parallel",),            # megacore split on v7x
            vmem_limit_bytes=vmem_limit_bytes,
        ),
    )(y_true, y_pred)

    s = jnp.sum(sums)          # total masked CE
    k = jnp.sum(cnts)          # number of kept rows
    mean_loss = s / k          # NaN when k == 0, matching torch's mean over empty
    factor = jnp.where(k > 0.0, jnp.float32(n) / k, jnp.float32(1.0))
    return mean_loss * factor


def _reference(y_pred, y_true):
    """Pure-JAX reference with identical semantics (for verification)."""
    mask = jnp.sum(y_true, axis=-1) > 0
    log_sm = jax.nn.log_softmax(y_true.astype(jnp.float32), axis=-1)
    ce_row = -jnp.sum(y_pred.astype(jnp.float32) * log_sm, axis=-1)
    k = jnp.sum(mask.astype(jnp.float32))
    s = jnp.sum(jnp.where(mask, ce_row, 0.0))
    n = jnp.float32(y_true.shape[0])
    factor = jnp.where(k > 0.0, n / k, jnp.float32(1.0))
    return (s / k) * factor


if __name__ == "__main__":
    key = jax.random.PRNGKey(0)
    k1, k2, k3 = jax.random.split(key, 3)

    # Small shapes: N not a multiple of the row tile -> exercises the masked
    # ragged last tile; C is the class/lane axis.
    N, C = 200, 40

    # y_pred: model output probabilities (soft targets of the swapped-arg CE)
    y_pred = jax.nn.softmax(jax.random.normal(k1, (N, C), dtype=jnp.float32), axis=-1)

    # y_true: one-hot labels with some unobserved (all-zero) rows
    labels = jax.random.randint(k2, (N,), 0, C)
    one_hot = jax.nn.one_hot(labels, C, dtype=jnp.float32)
    observed = (jax.random.uniform(k3, (N,)) > 0.3).astype(jnp.float32)  # ~70% observed
    y_true = one_hot * observed[:, None]

    # Explicit tm=64 -> 4 row tiles with a ragged final tile (rows 192..199).
    out = custom_categorical_cross_entropy_loss(y_pred, y_true, tm=64)
    out = jax.block_until_ready(out)

    ref = jax.block_until_ready(_reference(y_pred, y_true))
    np.testing.assert_allclose(np.asarray(out), np.asarray(ref), rtol=1e-4, atol=1e-4)

    print("KERNEL_OK")
</pallas_src>

<mosaic_0001>
module attributes {stable_mosaic.version = 11 : i64} {
  func.func @_cce_tile_kernel(%arg0: i32, %arg1: memref<64x40xf32, #tpu.memory_space<vmem>>, %arg2: memref<64x40xf32, #tpu.memory_space<vmem>>, %arg3: memref<1x1x1xf32, #tpu.memory_space<vmem>>, %arg4: memref<1x1x1xf32, #tpu.memory_space<vmem>>) attributes {dimension_semantics = [#tpu.dimension_semantics<parallel>], iteration_bounds = array<i64: 4>, scalar_prefetch = 0 : i64, scratch_operands = 0 : i64, tpu.core_type = #tpu.core_type<tc>, window_params = [{transform_indices = @transform_0, window_bounds = array<i64: 64, 40>}, {transform_indices = @transform_1, window_bounds = array<i64: 64, 40>}, {transform_indices = @transform_2, window_bounds = array<i64: 1, 1, 1>}, {transform_indices = @transform_3, window_bounds = array<i64: 1, 1, 1>}]} {
    %c0 = arith.constant 0 : index
    %c0_0 = arith.constant 0 : index
    %0 = vector.load %arg1[%c0, %c0_0] : memref<64x40xf32, #tpu.memory_space<vmem>>, vector<64x40xf32>
    %c0_1 = arith.constant 0 : index
    %c0_2 = arith.constant 0 : index
    %1 = vector.load %arg2[%c0_1, %c0_2] : memref<64x40xf32, #tpu.memory_space<vmem>>, vector<64x40xf32>
    %c64_i32 = arith.constant 64 : i32
    %2 = arith.muli %arg0, %c64_i32 : i32
    %3 = tpu.iota {dimensions = array<i32: 0>} : vector<64x1xi32>
    %4 = vector.broadcast %2 : i32 to vector<64x1xi32>
    %5 = arith.addi %4, %3 : vector<64x1xi32>
    %c200_i32 = arith.constant 200 : i32
    %6 = vector.broadcast %c200_i32 : i32 to vector<64x1xi32>
    %7 = arith.cmpi slt, %5, %6 : vector<64x1xi32>
    %cst = arith.constant dense<0.000000e+00> : vector<64xf32>
    %8 = vector.multi_reduction <add>, %0, %cst [1] : vector<64x40xf32> to vector<64xf32>
    %9 = vector.shape_cast %8 : vector<64xf32> to vector<64x1xf32>
    %cst_3 = arith.constant 0.000000e+00 : f32
    %10 = vector.broadcast %cst_3 : f32 to vector<64x1xf32>
    %11 = arith.cmpf ogt, %9, %10 : vector<64x1xf32>
    %12 = arith.andi %7, %11 : vector<64x1xi1>
    %cst_4 = arith.constant dense<0xFF800000> : vector<64xf32>
    %13 = vector.multi_reduction <maximumf>, %0, %cst_4 [1] : vector<64x40xf32> to vector<64xf32>
    %14 = vector.shape_cast %13 : vector<64xf32> to vector<64x1xf32>
    %15 = vector.broadcast %14 : vector<64x1xf32> to vector<64x40xf32>
    %16 = arith.subf %0, %15 : vector<64x40xf32>
    %17 = math.exp %16 : vector<64x40xf32>
    %cst_5 = arith.constant dense<0.000000e+00> : vector<64xf32>
    %18 = vector.multi_reduction <add>, %17, %cst_5 [1] : vector<64x40xf32> to vector<64xf32>
    %19 = vector.shape_cast %18 : vector<64xf32> to vector<64x1xf32>
    %20 = math.log %19 : vector<64x1xf32>
    %21 = arith.addf %14, %20 : vector<64x1xf32>
    %cst_6 = arith.constant dense<0.000000e+00> : vector<64xf32>
    %22 = vector.multi_reduction <add>, %1, %cst_6 [1] : vector<64x40xf32> to vector<64xf32>
    %23 = vector.shape_cast %22 : vector<64xf32> to vector<64x1xf32>
    %24 = arith.mulf %1, %0 : vector<64x40xf32>
    %cst_7 = arith.constant dense<0.000000e+00> : vector<64xf32>
    %25 = vector.multi_reduction <add>, %24, %cst_7 [1] : vector<64x40xf32> to vector<64xf32>
    %26 = vector.shape_cast %25 : vector<64xf32> to vector<64x1xf32>
    %27 = arith.mulf %21, %23 : vector<64x1xf32>
    %28 = arith.subf %27, %26 : vector<64x1xf32>
    %cst_8 = arith.constant 0.000000e+00 : f32
    %29 = vector.broadcast %cst_8 : f32 to vector<64x1xf32>
    %30 = arith.select %12, %28, %29 : vector<64x1xi1>, vector<64x1xf32>
    %cst_9 = arith.constant dense<0.000000e+00> : vector<1xf32>
    %31 = vector.multi_reduction <add>, %30, %cst_9 [0] : vector<64x1xf32> to vector<1xf32>
    %32 = vector.shape_cast %31 : vector<1xf32> to vector<1x1xf32>
    %c0_10 = arith.constant 0 : index
    %c0_11 = arith.constant 0 : index
    %c0_12 = arith.constant 0 : index
    %33 = vector.load %arg3[%c0_10, %c0_11, %c0_12] : memref<1x1x1xf32, #tpu.memory_space<vmem>>, vector<1x1x1xf32>
    %34 = vector.shape_cast %33 : vector<1x1x1xf32> to vector<1x1xf32>
    %35 = vector.shape_cast %32 : vector<1x1xf32> to vector<1x1x1xf32>
    tpu.vector_store %arg3[%c0_10, %c0_11, %c0_12], %35 {strides = array<i32>} : memref<1x1x1xf32, #tpu.memory_space<vmem>>, vector<1x1x1xf32>,
    %36 = arith.extui %12 : vector<64x1xi1> to vector<64x1xi32>
    %37 = arith.sitofp %36 : vector<64x1xi32> to vector<64x1xf32>
    %cst_13 = arith.constant dense<0.000000e+00> : vector<1xf32>
    %38 = vector.multi_reduction <add>, %37, %cst_13 [0] : vector<64x1xf32> to vector<1xf32>
    %39 = vector.shape_cast %38 : vector<1xf32> to vector<1x1xf32>
    %c0_14 = arith.constant 0 : index
    %c0_15 = arith.constant 0 : index
    %c0_16 = arith.constant 0 : index
    %40 = vector.load %arg4[%c0_14, %c0_15, %c0_16] : memref<1x1x1xf32, #tpu.memory_space<vmem>>, vector<1x1x1xf32>
    %41 = vector.shape_cast %40 : vector<1x1x1xf32> to vector<1x1xf32>
    %42 = vector.shape_cast %39 : vector<1x1xf32> to vector<1x1x1xf32>
    tpu.vector_store %arg4[%c0_14, %c0_15, %c0_16], %42 {strides = array<i32>} : memref<1x1x1xf32, #tpu.memory_space<vmem>>, vector<1x1x1xf32>,
    return
  }
  func.func @transform_0(%arg0: i32) -> (i32, i32) {
    %c0_i32 = arith.constant 0 : i32
    %c0_i32_0 = arith.constant 0 : i32
    return %arg0, %c0_i32 : i32, i32
  }
  func.func @transform_1(%arg0: i32) -> (i32, i32) {
    %c0_i32 = arith.constant 0 : i32
    %c0_i32_0 = arith.constant 0 : i32
    return %arg0, %c0_i32 : i32, i32
  }
  func.func @transform_2(%arg0: i32) -> (i32, i32, i32) {
    %c0_i32 = arith.constant 0 : i32
    %c0_i32_0 = arith.constant 0 : i32
    %c0_i32_1 = arith.constant 0 : i32
    return %arg0, %c0_i32, %c0_i32_0 : i32, i32, i32
  }
  func.func @transform_3(%arg0: i32) -> (i32, i32, i32) {
    %c0_i32 = arith.constant 0 : i32
    %c0_i32_0 = arith.constant 0 : i32
    %c0_i32_1 = arith.constant 0 : i32
    return %arg0, %c0_i32, %c0_i32_0 : i32, i32, i32
  }
}

</mosaic_0001>

<bundles_post_ra>
// kernel: tpu_custom_call.1
= control target key start
LH: loop header
LB: loop body
LE: loop exit
PB: predicated region body
PF: predicated region fallthrough
CT: control target
= control target key end

     0   :  { %s719_s12 = smov 0   ;;  %s976_s0 = inlined_call_operand.vmem [shape: f32[200,40], index: 0, kind: input, shape index: {}]   ;;  %s977_s1 = inlined_call_operand.vmem [shape: f32[200,40], index: 1, kind: input, shape index: {}]   ;;  %s978_s2 = inlined_call_operand.vmem [shape: f32[4,1,1], index: 2, kind: output, shape index: {0}]   ;;  %s979_s3 = inlined_call_operand.vmem [shape: f32[4,1,1], index: 3, kind: output, shape index: {1}]  }
   0x1 LB: > { %s725_s13 = sadd.s32 4294967295, %s696_s12   ;;  %p633_p0 = scmp.ge.s32.totalorder %s696_s12, 1  ;;  %s696_s12 = sphi %s719_s12, %s14_s12  }
   0x2   : > { %p168_p1 = scmp.lt.s32.totalorder %s696_s12, 5 }
   0x4   : > { %p169_p2 = pnand %p633_p0, %p168_p1 }
   0x5   : > { %s634_s14 = sshll.u32 (!%p169_p2), %s725_s13, 3  ;;  %s638_s22 = sshll.u32 (!%p169_p2), %s725_s13, 6 }
   0x6   : > { %172 = sbr.rel (%p169_p2) target bundleno = 321 (0x141), region = 28  ;;  %p211_p3 = scmp.lt.s32.totalorder (!%p169_p2), %s634_s14, 24 }
   0x7   : > { %p234_p4 = scmp.lt.s32.totalorder (!%p169_p2), %s725_s13, 3 }
   0xb   : > { %s993_s14 = smov (!%p211_p3, %s634_s14), 24  ;;  %vm283_vm0 = vcmask 326656   ;;  %s995_s13 = smov (!%p234_p4, %s725_s13), 3 }
   0xc   : > { %s635_s15 = sshll.u32 %s993_s14, 3  ;;  %s239_s25 = scalar_lea.vmem %s979_s3, %s995_s13 }
   0xd   : > { %s214_s18 = scalar_lea.vmem %s976_s0, %s635_s15  ;;  %s781_s21 = scalar_lea.vmem %s977_s1, %s635_s15 }
   0xe   : > { %v738_v0 = vld [vmem:[%s214_s18 + $0x20] sm:$0xff]  ;;  %v740_v1 = vld [vmem:[%s214_s18 + $0x10] sm:$0xff]  ;;  %v750_v6 = vld [vmem:[%s214_s18 + $0x28] sm:$0xff]  ;;  %s236_s28 = scalar_lea.vmem %s978_s2, %s995_s13 }
   0xf   : > { %v742_v2 = vld [vmem:[%s214_s18] sm:$0xff]  ;;  %v336_v3 = vsel %vm283_vm0, %v738_v0, -inf  ;;  %v330_v4 = vsel %vm283_vm0, %v740_v1, -inf  ;;  %v752_v7 = vld [vmem:[%s214_s18 + $0x18] sm:$0xff]  ;;  %v754_v8 = vld [vmem:[%s214_s18 + $0x8] sm:$0xff]  ;;  %v339_v9 = vsel %vm283_vm0, %v750_v6, -inf }
  0x10   : > { %v324_v5 = vsel %vm283_vm0, %v742_v2, -inf  ;;  %337 = vmax.xlane.f32.xlu2 %v336_v3  ;;  %331 = vmax.xlane.f32.xlu1 %v330_v4  ;;  %v333_v10 = vsel %vm283_vm0, %v752_v7, -inf  ;;  %v327_v11 = vsel %vm283_vm0, %v754_v8, -inf  ;;  %v762_v12 = vld [vmem:[%s214_s18 + $0x38] sm:$0xff]  ;;  %v764_v13 = vld [vmem:[%s214_s18 + $0x30] sm:$0xff]  ;;  %v284_v15 = vsel %vm283_vm0, %v742_v2, 0.0 }
  0x11   : > { %325 = vmax.xlane.f32.xlu0 %v324_v5  ;;  %v345_v14 = vsel %vm283_vm0, %v762_v12, -inf  ;;  %v342_v16 = vsel %vm283_vm0, %v764_v13, -inf  ;;  %v290_v17 = vsel %vm283_vm0, %v740_v1, 0.0  ;;  %v293_v18 = vsel %vm283_vm0, %v752_v7, 0.0  ;;  %v249_v20 = vld [vmem:[%s781_s21 + $0x8] sm:$0xff]  ;;  %v248_v22 = vld [vmem:[%s781_s21] sm:$0xff] }
  0x12   : > { %v287_v19 = vsel %vm283_vm0, %v754_v8, 0.0  ;;  %v445_v21 = vmul.f32 %v249_v20, %v754_v8  ;;  %v420_v24 = vsel %vm283_vm0, %v248_v22, 0.0  ;;  %v296_v25 = vsel %vm283_vm0, %v738_v0, 0.0  ;;  %v252_v26 = vld [vmem:[%s781_s21 + $0x20] sm:$0xff]  ;;  %v250_v27 = vld [vmem:[%s781_s21 + $0x10] sm:$0xff]  ;;  %v803_v36 = vld [vmem:[%s781_s21 + $0x28] sm:$0xff] }
  0x13   : > { %v432_v28 = vsel %vm283_vm0, %v252_v26, 0.0  ;;  %v426_v29 = vsel %vm283_vm0, %v250_v27, 0.0  ;;  %v423_v30 = vsel %vm283_vm0, %v249_v20, 0.0  ;;  %v444_v31 = vmul.f32 %v248_v22, %v742_v2  ;;  %v251_v37 = vld [vmem:[%s781_s21 + $0x18] sm:$0xff] }
  0x14   : > { %v455_v23 = vsel %vm283_vm0, %v445_v21, 0.0  ;;  %v446_v33 = vmul.f32 %v250_v27, %v740_v1  ;;  %v448_v35 = vmul.f32 %v252_v26, %v738_v0  ;;  %v435_v39 = vsel %vm283_vm0, %v803_v36, 0.0 }
  0x15   : > { %v452_v32 = vsel %vm283_vm0, %v444_v31, 0.0  ;;  %v429_v40 = vsel %vm283_vm0, %v251_v37, 0.0  ;;  %v447_v41 = vmul.f32 %v251_v37, %v752_v7  ;;  %v698_v37 = vmov 0.0  }
  0x16   : > { %v458_v34 = vsel %vm283_vm0, %v446_v33, 0.0  ;;  %v464_v38 = vsel %vm283_vm0, %v448_v35, 0.0 }
  0x17   : > { %v461_v42 = vsel %vm283_vm0, %v447_v41, 0.0  ;;  %v255_v41 = vld [vmem:[%s781_s21 + $0x38] sm:$0xff] }
  0x18   : > { %340 = vmax.xlane.f32.xlu2 %v339_v9  ;;  %334 = vmax.xlane.f32.xlu1 %v333_v10 }
  0x19   : > { %328 = vmax.xlane.f32.xlu0 %v327_v11 }
  0x20   : > { %346 = vmax.xlane.f32.xlu1 %v345_v14  ;;  %285 = vadd.xlane.f32.xlu2 %v284_v15 }
  0x21   : > { %343 = vmax.xlane.f32.xlu0 %v342_v16  ;;  %v254_v16 = vld [vmem:[%s781_s21 + $0x30] sm:$0xff] }
  0x22   : > { %v438_v21 = vsel %vm283_vm0, %v254_v16, 0.0 }
  0x28   : > { %291 = vadd.xlane.f32.xlu1 %v290_v17  ;;  %294 = vadd.xlane.f32.xlu2 %v293_v18  ;;  %v257_v17 = vlaneseq }
  0x29   : > { %288 = vadd.xlane.f32.xlu0 %v287_v19  ;;  %v851_v19 = vstv %s638_s22 }
  0x2a   : > { %v853_v20 = vshrl.u32 %v257_v17, 7 }
  0x30   : > { %456 = vadd.xlane.f32.xlu1 %v455_v23  ;;  %421 = vadd.xlane.f32.xlu2 %v420_v24  ;;  %v259_v23 = vadd.s32 8, %v853_v20  ;;  %v267_v24 = vadd.s32 %v851_v19, %v853_v20 }
  0x31   : > { %297 = vadd.xlane.f32.xlu0 %v296_v25  ;;  %v260_v25 = vadd.s32 16, %v853_v20 }
  0x32   : > { %v268_v31 = vadd.s32 %v851_v19, %v259_v23  ;;  %vm275_vm3 = vcmp.lt.s32.totalorder %v267_v24, 200 }
  0x34   : > { %vm276_vm6 = vcmp.lt.s32.totalorder %v268_v31, 200 }
  0x38   : > { %433 = vadd.xlane.f32.xlu1 %v432_v28  ;;  %427 = vadd.xlane.f32.xlu2 %v426_v29  ;;  %v261_v29 = vadd.s32 24, %v853_v20 }
  0x39   : > { %424 = vadd.xlane.f32.xlu0 %v423_v30 }
  0x3a   : > { %v270_v35 = vadd.s32 %v851_v19, %v261_v29 }
  0x3c   : > { %vm278_vm9 = vcmp.lt.s32.totalorder %v270_v35, 200 }
  0x40   : > { %465 = vadd.xlane.f32.xlu1 %v464_v38  ;;  %430 = vadd.xlane.f32.xlu2 %v429_v40 }
  0x41   : > { %453 = vadd.xlane.f32.xlu0 %v452_v32 }
  0x48   : > { %462 = vadd.xlane.f32.xlu2 %v461_v42 }
  0x49   : > { %459 = vadd.xlane.f32.xlu0 %v458_v34  ;;  %v269_v34 = vadd.s32 %v851_v19, %v260_v25 }
  0x4b   : > { %vm277_vm8 = vcmp.lt.s32.totalorder %v269_v34, 200 }
  0x51   : > { %436 = vadd.xlane.f32.xlu0 %v435_v39 }
  0x83   : > { %v812_v43 = vpop.xlane.xlu2 %337  ;;  %v814_v44 = vpop.xlane.xlu1 %331 }
  0x84   : > { %v350_v45 = vsub.f32 %v740_v1, %v814_v44  ;;  %v818_v46 = vpop.xlane.xlu0 %325  ;;  %v352_v61 = vsub.f32 %v738_v0, %v812_v43 }
  0x85   : > { %v348_v47 = vsub.f32 %v742_v2, %v818_v46 }
  0x86   : > { %v360_v48 = vmul.f32 1.442695, %v350_v45  ;;  %v364_v2 = vmul.f32 1.442695, %v352_v61  ;;  %v449_v61 = vmul.f32 %v803_v36, %v750_v6 }
  0x87   : > { %v356_v49 = vmul.f32 1.442695, %v348_v47 }
  0x88   : > { %658 = vpow2.f32 %v360_v48 }
  0x89   : > { %660 = vpow2.f32 %v356_v49 }
  0x8b   : > { %v822_v50 = vpop.xlane.xlu2 %340  ;;  %v824_v51 = vpop.xlane.xlu1 %334 }
  0x8c   : > { %v353_v52 = vsub.f32 %v750_v6, %v822_v50  ;;  %v351_v53 = vsub.f32 %v752_v7, %v824_v51  ;;  %v830_v54 = vpop.xlane.xlu0 %328 }
  0x8d   : > { %v349_v55 = vsub.f32 %v754_v8, %v830_v54 }
  0x8e   : > { %v366_v56 = vmul.f32 1.442695, %v353_v52  ;;  %v362_v57 = vmul.f32 1.442695, %v351_v53  ;;  %v659_v58 = vpop.eup %658  ;;  %v441_v53 = vsel %vm283_vm0, %v255_v41, 0.0 }
  0x8f   : > { %v358_v59 = vmul.f32 1.442695, %v349_v55  ;;  %v661_v60 = vpop.eup %660  ;;  %v378_v62 = vsel %vm283_vm0, %v659_v58, 0.0 }
  0x90   : > { %662 = vpow2.f32 %v366_v56  ;;  %379 = vadd.xlane.f32.xlu0 %v378_v62  ;;  %v372_v63 = vsel %vm283_vm0, %v661_v60, 0.0  ;;  %v451_v60 = vmul.f32 %v255_v41, %v762_v12 }
  0x91   : > { %664 = vpow2.f32 %v362_v57  ;;  %373 = vadd.xlane.f32.xlu1 %v372_v63  ;;  %v299_v57 = vsel %vm283_vm0, %v750_v6, 0.0  ;;  %v467_v63 = vsel %vm283_vm0, %v449_v61, 0.0 }
  0x92   : > { %666 = vpow2.f32 %v358_v59  ;;  %v473_v62 = vsel %vm283_vm0, %v451_v60, 0.0 }
  0x93   : > { %v838_v1 = vpop.xlane.xlu1 %346  ;;  %668 = vpow2.f32 %v364_v2  ;;  %v286_v18 = vpop.xlane.xlu2 %285  ;;  %v302_v2 = vsel %vm283_vm0, %v764_v13, 0.0 }
  0x94   : > { %v840_v3 = vpop.xlane.xlu0 %343  ;;  %v355_v0 = vsub.f32 %v762_v12, %v838_v1  ;;  %vm308_vm1 = vcmp.gt.f32.partialorder %v286_v18, 0.0 }
  0x95   : > { %v354_v4 = vsub.f32 %v764_v13, %v840_v3  ;;  %vm864_vm4 = vmand %vm275_vm3, %vm308_vm1 }
  0x96   : > { %v663_v5 = vpop.eup %662  ;;  %v370_v15 = vmul.f32 1.442695, %v355_v0  ;;  %v639_v38 = vsel %vm864_vm4, 1.0, %v698_v37 }
  0x97   : > { %v665_v7 = vpop.eup %664  ;;  %v368_v8 = vmul.f32 1.442695, %v354_v4  ;;  %v387_v9 = vsel %vm283_vm0, %v663_v5, 0.0  ;;  %v450_v4 = vmul.f32 %v254_v16, %v764_v13  ;;  %v305_v5 = vsel %vm283_vm0, %v762_v12, 0.0 }
  0x98   : > { %v667_v10 = vpop.eup %666  ;;  %v381_v11 = vsel %vm283_vm0, %v665_v7, 0.0  ;;  %388 = vadd.xlane.f32.xlu0 %v387_v9  ;;  %v262_v7 = vadd.s32 32, %v853_v20 }
  0x99   : > { %670 = vpow2.f32 %v368_v8  ;;  %v375_v14 = vsel %vm283_vm0, %v667_v10, 0.0  ;;  %382 = vadd.xlane.f32.xlu1 %v381_v11  ;;  %v669_v22 = vpop.eup %668  ;;  %v470_v0 = vsel %vm283_vm0, %v450_v4, 0.0 }
  0x9a   : > { %376 = vadd.xlane.f32.xlu2 %v375_v14  ;;  %672 = vpow2.f32 %v370_v15  ;;  %v384_v32 = vsel %vm283_vm0, %v669_v22, 0.0  ;;  %v271_v6 = vadd.s32 %v851_v19, %v262_v7 }
  0x9b   : > { %v292_v26 = vpop.xlane.xlu1 %291  ;;  %v295_v39 = vpop.xlane.xlu2 %294 }
  0x9c   : > { %v289_v28 = vpop.xlane.xlu0 %288  ;;  %vm310_vm5 = vcmp.gt.f32.partialorder %v292_v26, 0.0  ;;  %vm311_vm10 = vcmp.gt.f32.partialorder %v295_v39, 0.0  ;;  %vm279_vm13 = vcmp.lt.s32.totalorder %v271_v6, 200 }
  0x9d   : > { %vm309_vm2 = vcmp.gt.f32.partialorder %v289_v28, 0.0  ;;  %vm883_vm11 = vmand %vm277_vm8, %vm310_vm5 }
  0x9e   : > { %vm875_vm7 = vmand %vm276_vm6, %vm309_vm2  ;;  %v641_v49 = vsel %vm883_vm11, 1.0, %v698_v37 }
  0x9f   : > { %v671_v27 = vpop.eup %670  ;;  %v640_v45 = vsel %vm875_vm7, 1.0, %v698_v37  ;;  %vm890_vm12 = vmand %vm278_vm9, %vm311_vm10  ;;  %vm513_vm9 = vcmask 0  }
  0xa0   : > { %v390_v30 = vsel %vm283_vm0, %v671_v27, 0.0  ;;  %439 = vadd.xlane.f32.xlu0 %v438_v21  ;;  %v673_v40 = vpop.eup %672  ;;  %v531_v48 = vadd.f32 %v640_v45, %v639_v38  ;;  %v642_v55 = vsel %vm890_vm12, 1.0, %v698_v37 }
  0xa1   : > { %391 = vadd.xlane.f32.xlu1 %v390_v30  ;;  %v393_v56 = vsel %vm283_vm0, %v673_v40, 0.0 }
  0xa2   : > { %385 = vadd.xlane.f32.xlu2 %v384_v32  ;;  %v532_v58 = vadd.f32 %v641_v49, %v531_v48 }
  0xa3   : > { %v422_v10 = vpop.xlane.xlu2 %421  ;;  %v457_v14 = vpop.xlane.xlu1 %456 }
  0xa4   : > { %v533_v59 = vadd.f32 %v642_v55, %v532_v58  ;;  %v298_v36 = vpop.xlane.xlu0 %297 }
  0xa5   : > { %vm312_vm14 = vcmp.gt.f32.partialorder %v298_v36, 0.0 }
  0xa6   : > { %vm914_vm15 = vmand %vm279_vm13, %vm312_vm14 }
  0xa7   : > { %v643_v13 = vsel %vm914_vm15, 1.0, %v698_v37 }
  0xa8   : > { %442 = vadd.xlane.f32.xlu0 %v441_v53  ;;  %v921_v9 = vadd.f32 %v643_v13, %v533_v59 }
  0xa9   : > { %394 = vadd.xlane.f32.xlu1 %v393_v56 }
  0xaa   : > { %300 = vadd.xlane.f32.xlu2 %v299_v57 }
  0xab   : > { %v428_v15 = vpop.xlane.xlu2 %427  ;;  %v434_v17 = vpop.xlane.xlu1 %433 }
  0xac   : > { %v425_v12 = vpop.xlane.xlu0 %424 }
  0xb0   : > { %474 = vadd.xlane.f32.xlu0 %v473_v62  ;;  %v263_v62 = vadd.s32 40, %v853_v20 }
  0xb1   : > { %468 = vadd.xlane.f32.xlu1 %v467_v63 }
  0xb2   : > { %303 = vadd.xlane.f32.xlu2 %v302_v2  ;;  %v272_v33 = vadd.s32 %v851_v19, %v263_v62 }
  0xb3   : > { %v431_v18 = vpop.xlane.xlu2 %430  ;;  %v925_v22 = vpop.xlane.xlu1 %465 }
  0xb4   : > { %v454_v11 = vpop.xlane.xlu0 %453  ;;  %vm280_vm0 = vcmp.lt.s32.totalorder %v272_v33, 200 }
  0xb9   : > { %471 = vadd.xlane.f32.xlu1 %v470_v0 }
  0xba   : > { %306 = vadd.xlane.f32.xlu2 %v305_v5  ;;  %v264_v5 = vadd.s32 48, %v853_v20 }
  0xbb   : > { %v463_v23 = vpop.xlane.xlu2 %462 }
  0xbc   : > { %v460_v16 = vpop.xlane.xlu0 %459 }
  0xc4   : > { %v923_v21 = vpop.xlane.xlu0 %436 }
 0x103   : > { %v380_v24 = vpop.xlane.xlu0 %379 }
 0x104   : > { %v374_v25 = vpop.xlane.xlu1 %373 }
 0x105   : > { %674 = vlog2.f32 %v374_v25 }
 0x106   : > { %676 = vlog2.f32 %v380_v24  ;;  %v265_v24 = vadd.s32 56, %v853_v20 }
 0x108   : > { %v274_v20 = vadd.s32 %v851_v19, %v265_v24 }
 0x10a   : > { %vm282_vm6 = vcmp.lt.s32.totalorder %v274_v20, 200 }
 0x10b   : > { %v675_v26 = vpop.eup %674  ;;  %v389_v32 = vpop.xlane.xlu0 %388 }
 0x10c   : > { %v677_v27 = vpop.eup %676  ;;  %v397_v28 = vmul.f32 0.6931472, %v675_v26  ;;  %v383_v29 = vpop.xlane.xlu1 %382 }
 0x10d   : > { %v377_v30 = vpop.xlane.xlu2 %376  ;;  %678 = vlog2.f32 %v383_v29  ;;  %v401_v31 = vmul.f32 0.6931472, %v677_v27 }
 0x10e   : > { %680 = vlog2.f32 %v377_v30  ;;  %v412_v34 = vadd.f32 %v397_v28, %v818_v46 }
 0x10f   : > { %v414_v38 = vadd.f32 %v401_v31, %v814_v44  ;;  %682 = vlog2.f32 %v389_v32 }
 0x110   : > { %v476_v40 = vmul.f32 %v422_v10, %v412_v34 }
 0x111   : > { %v478_v55 = vmul.f32 %v428_v15, %v414_v38 }
 0x112   : > { %v484_v58 = vsub.f32 %v476_v40, %v454_v11 }
 0x113   : > { %v679_v35 = vpop.eup %678  ;;  %v440_v57 = vpop.xlane.xlu0 %439  ;;  %v486_v44 = vsub.f32 %v478_v55, %v460_v16 }
 0x114   : > { %v681_v39 = vpop.eup %680  ;;  %v403_v41 = vmul.f32 0.6931472, %v679_v35  ;;  %v392_v45 = vpop.xlane.xlu1 %391  ;;  %v492_v2 = vsel %vm864_vm4, %v484_v58, 0.0 }
 0x115   : > { %v386_v48 = vpop.xlane.xlu2 %385  ;;  %v399_v49 = vmul.f32 0.6931472, %v681_v39  ;;  %v683_v59 = vpop.eup %682  ;;  %v494_v13 = vsel %vm883_vm11, %v486_v44, 0.0 }
 0x116   : > { %v415_v53 = vadd.f32 %v403_v41, %v824_v51  ;;  %684 = vlog2.f32 %v386_v48  ;;  %v407_v4 = vmul.f32 0.6931472, %v683_v59 }
 0x117   : > { %v413_v56 = vadd.f32 %v399_v49, %v830_v54  ;;  %686 = vlog2.f32 %v392_v45 }
 0x118   : > { %v479_v46 = vmul.f32 %v431_v18, %v415_v53  ;;  %v273_v18 = vadd.s32 %v851_v19, %v264_v5 }
 0x119   : > { %v477_v60 = vmul.f32 %v425_v12, %v413_v56 }
 0x11a   : > { %v487_v54 = vsub.f32 %v479_v46, %v463_v23  ;;  %vm281_vm2 = vcmp.lt.s32.totalorder %v273_v18, 200 }
 0x11b   : > { %v485_v61 = vsub.f32 %v477_v60, %v457_v14  ;;  %v417_v14 = vadd.f32 %v407_v4, %v822_v50  ;;  %v443_v16 = vpop.xlane.xlu0 %442 }
 0x11c   : > { %v685_v63 = vpop.eup %684  ;;  %v395_v51 = vpop.xlane.xlu1 %394  ;;  %v495_v42 = vsel %vm890_vm12, %v487_v54, 0.0 }
 0x11d   : > { %v301_v0 = vpop.xlane.xlu2 %300  ;;  %v493_v7 = vsel %vm875_vm7, %v485_v61, 0.0  ;;  %v405_v6 = vmul.f32 0.6931472, %v685_v63  ;;  %688 = vlog2.f32 %v395_v51  ;;  %v687_v10 = vpop.eup %686  ;;  %v481_v50 = vmul.f32 %v923_v21, %v417_v14 }
 0x11e   : > { %v500_v36 = vadd.f32 %v493_v7, %v492_v2  ;;  %v409_v25 = vmul.f32 0.6931472, %v687_v10  ;;  %vm313_vm1 = vcmp.gt.f32.partialorder %v301_v0, 0.0 }
 0x11f   : > { %v416_v12 = vadd.f32 %v405_v6, %v812_v43  ;;  %vm321_vm4 = vmand %vm280_vm0, %vm313_vm1 }
 0x120   : > { %v501_v11 = vadd.f32 %v500_v36, %v494_v13  ;;  %v418_v29 = vadd.f32 %v409_v25, %v840_v3  ;;  %v644_v21 = vsel %vm321_vm4, 1.0, %v698_v37 }
 0x121   : > { %v480_v15 = vmul.f32 %v434_v17, %v416_v12  ;;  %v535_v3 = vadd.f32 %v644_v21, %v921_v9 }
 0x122   : > { %v502_v23 = vadd.f32 %v501_v11, %v495_v42  ;;  %v482_v8 = vmul.f32 %v440_v57, %v418_v29 }
 0x123   : > { %v689_v47 = vpop.eup %688  ;;  %v488_v43 = vsub.f32 %v480_v15, %v925_v22  ;;  %v475_v19 = vpop.xlane.xlu0 %474 }
 0x124   : > { %v411_v26 = vmul.f32 0.6931472, %v689_v47  ;;  %v469_v27 = vpop.xlane.xlu1 %468 }
 0x125   : > { %v304_v28 = vpop.xlane.xlu2 %303  ;;  %v496_v52 = vsel %vm914_vm15, %v488_v43, 0.0  ;;  %v489_v30 = vsub.f32 %v481_v50, %v469_v27 }
 0x126   : > { %vm314_vm3 = vcmp.gt.f32.partialorder %v304_v28, 0.0  ;;  %v503_v17 = vadd.f32 %v502_v23, %v496_v52  ;;  %v419_v22 = vadd.f32 %v411_v26, %v838_v1 }
 0x127   : > { %vm953_vm5 = vmand %vm281_vm2, %vm314_vm3  ;;  %v497_v34 = vsel %vm321_vm4, %v489_v30, 0.0 }
 0x128   : > { %v483_v32 = vmul.f32 %v443_v16, %v419_v22  ;;  %v645_v35 = vsel %vm953_vm5, 1.0, %v698_v37  ;;  %v504_v40 = vadd.f32 %v503_v17, %v497_v34 }
 0x129   : > { %v536_v41 = vadd.f32 %v645_v35, %v535_v3 }
 0x12a   : > { %v491_v45 = vsub.f32 %v483_v32, %v475_v19 }
 0x12c   : > { %v472_v1 = vpop.xlane.xlu1 %471 }
 0x12d   : > { %v307_v38 = vpop.xlane.xlu2 %306  ;;  %v490_v39 = vsub.f32 %v482_v8, %v472_v1 }
 0x12e   : > { %vm315_vm7 = vcmp.gt.f32.partialorder %v307_v38, 0.0 }
 0x12f   : > { %vm323_vm8 = vmand %vm282_vm6, %vm315_vm7  ;;  %v498_v48 = vsel %vm953_vm5, %v490_v39, 0.0 }
 0x130   : > { %v646_v49 = vsel %vm323_vm8, 1.0, %v698_v37  ;;  %v505_v53 = vadd.f32 %v504_v40, %v498_v48  ;;  %v499_v56 = vsel %vm323_vm8, %v491_v45, 0.0 }
 0x131   : > { %v537_v55 = vadd.f32 %v646_v49, %v536_v41 }
 0x132   : > { %v506_v57 = vadd.f32 %v505_v53, %v499_v56 }
 0x133   : > { %v538_v9 = vrot.slane %v537_v55, 4 }
 0x134   : > { %v507_v58 = vrot.slane %v506_v57, 4 }
 0x135   : > { %v539_v59 = vadd.f32 %v538_v9, %v537_v55 }
 0x136   : > { %v508_v46 = vadd.f32 %v507_v58, %v506_v57 }
 0x137   : > { %v540_v60 = vrot.slane %v539_v59, 2 }
 0x138   : > { %v509_v44 = vrot.slane %v508_v46, 2 }
 0x139   : > { %v541_v61 = vadd.f32 %v540_v60, %v539_v59 }
 0x13a   : > { %v510_v62 = vadd.f32 %v509_v44, %v508_v46 }
 0x13b   : > { %v542_v63 = vrot.slane %v541_v61, 1 }
 0x13c   : > { %v511_v37 = vrot.slane %v510_v62, 1 }
 0x13d   : > { %v543_v2 = vadd.f32 %v542_v63, %v541_v61 }
 0x13e   : > { %v512_v4 = vadd.f32 %v511_v37, %v510_v62 }
 0x13f   : > { %544 = vst.msk [vmem:[%s239_s25] sm:$0x1] %vm513_vm9, %v543_v2 }
 0x140   : > { %514 = vst.msk [vmem:[%s236_s28] sm:$0x1] %vm513_vm9, %v512_v4 }
 0x141 PF: > { %s14_s12 = sadd.s32 1, %s696_s12  }
 0x142   : > { %p11_p5 = scmp.ge.s32.totalorder %s14_s12, 6  }
 0x144   :  { %13 = sbr.rel (!%p11_p5) target bundleno = 1 (0x1), region = 73 }

</bundles_post_ra>
